<compile_context>
chip_gen: v7x
topology: tpu7x:2x2x1
jax: 0.10.0
libtpu: 0.0.40
codegen_flags: <defaults>
</compile_context>

<pallas_src>
import jax
import jax.numpy as jnp
import numpy as np
from jax import lax
from jax.experimental import pallas as pl
from jax.experimental.pallas import tpu as pltpu


def mfb_kernel(img_ref, ques_ref, wi_ref, bi_ref, wq_ref, bq_ref,
               s_ref, g_ref, p_ref, z_ref, exp_ref):
    # img_ref : (R, Di) with R = TB*C, ques_ref : (TB, Dq)
    # wi/wq are bf16; biases and 0/1 helper matrices are f32.
    x = img_ref[...].astype(jnp.bfloat16)          # (R, Di)
    q = ques_ref[...].astype(jnp.bfloat16)         # (TB, Dq)

    # Linear projections on the MXU (bf16 inputs, f32 accumulation) + bias.
    proj_i = jnp.dot(x, wi_ref[...],
                     preferred_element_type=jnp.float32) + bi_ref[...]      # (R, KO)
    proj_q = jnp.dot(q, wq_ref[...],
                     preferred_element_type=jnp.float32) + bq_ref[...]      # (TB, KO)

    # Broadcast each sample's ques projection over its C channels with a 0/1
    # selection matmul (S[r, t] = 1 iff r // C == t) -- avoids an in-kernel
    # relayouting reshape and runs on the MXU.
    proj_q_b = jnp.dot(s_ref[...], proj_q,
                       preferred_element_type=jnp.float32)                  # (R, KO)

    # Bilinear elementwise product (exp_in == 1 for the is_first=True path).
    exp_out = proj_i * proj_q_b                                             # (R, KO)
    exp_ref[...] = exp_out.astype(exp_ref.dtype)

    # Sum-pool over K consecutive features (AvgPool1d(K, stride=K) * K) as a
    # matmul against the precomputed 0/1 pooling matrix P[(o*K+k), o] = 1.
    z = jnp.dot(exp_out, p_ref[...],
                preferred_element_type=jnp.float32)                         # (R, O)

    # Signed square root: sign(z) * sqrt(|z|) == sqrt(relu(z)) - sqrt(relu(-z))
    z = jnp.where(z >= 0.0, 1.0, -1.0) * jnp.sqrt(jnp.abs(z))

    # Per-sample L2 normalization over the flattened (C*O) features.
    # G[r, r'] = 1 iff rows r, r' belong to the same sample, so
    # (G @ (z*z)) row-summed gives each row its sample's sum of squares.
    zsq = z * z
    sumsq = jnp.sum(jnp.dot(g_ref[...], zsq,
                            preferred_element_type=jnp.float32),
                    axis=-1, keepdims=True)                                 # (R, 1)
    z = z * lax.rsqrt(jnp.maximum(sumsq, 1e-24))

    z_ref[...] = z.astype(z_ref.dtype)


def _pick_tb(n, c, target_rows=256):
    """Pick a batch tile TB: divides N, respects the (8, .) sublane rule,
    targets ~target_rows matmul rows per step, and prefers a grid of length
    >= 2 so a 2-TensorCore (v7x) chip gets balanced work."""
    def ok(d):
        return n % d == 0 and (d == n or (d % 8 == 0 and (d * c) % 8 == 0))
    cands = [d for d in range(1, n + 1) if ok(d)]
    small = [d for d in cands if d * c <= target_rows]
    tb = max(small) if small else min(cands)
    if n // tb == 1:
        multi = [d for d in cands if n // d >= 2]
        if multi:
            fit = [d for d in multi if d * c <= target_rows]
            tb = max(fit) if fit else min(multi)
    return tb


def mfb_forward(img_feat, ques_feat, wi, bi, wq, bq, mfb_k, mfb_o, tb=None):
    N, C, Di = img_feat.shape
    Nq, one, Dq = ques_feat.shape
    KO = mfb_k * mfb_o
    assert Nq == N and one == 1
    assert wi.shape == (Di, KO) and wq.shape == (Dq, KO)
    assert bi.shape == (1, KO) and bq.shape == (1, KO)

    if tb is None:
        tb = _pick_tb(N, C)
    assert N % tb == 0
    rows = tb * C
    grid = (N // tb,)

    # Free XLA reshapes to feature-last 2-D layouts (no in-kernel reshapes).
    img2 = img_feat.reshape(N * C, Di)
    ques2 = ques_feat.reshape(N, Dq)

    # bf16 weights for native MXU throughput (f32 accumulation in-kernel).
    wi_bf = wi.astype(jnp.bfloat16)
    wq_bf = wq.astype(jnp.bfloat16)

    # Constant 0/1 helper matrices, built once, VMEM-resident (constant index_map).
    s_np = (np.arange(rows)[:, None] // C == np.arange(tb)[None, :]).astype(np.float32)
    g_np = s_np @ s_np.T                                                    # (rows, rows)
    p_np = (np.arange(KO)[:, None] // mfb_k == np.arange(mfb_o)[None, :]).astype(np.float32)
    S = jnp.asarray(s_np)
    G = jnp.asarray(g_np)
    P = jnp.asarray(p_np)

    out_shape = (
        jax.ShapeDtypeStruct((N * C, mfb_o), jnp.float32),   # z (flattened)
        jax.ShapeDtypeStruct((N * C, KO), jnp.float32),      # exp_out (flattened)
    )

    z2, exp2 = pl.pallas_call(
        mfb_kernel,
        out_shape=out_shape,
        grid_spec=pltpu.PrefetchScalarGridSpec(
            num_scalar_prefetch=0,
            grid=grid,
            in_specs=[
                pl.BlockSpec((rows, Di), lambda n: (n, 0)),      # img (streamed)
                pl.BlockSpec((tb, Dq), lambda n: (n, 0)),        # ques (streamed)
                pl.BlockSpec((Di, KO), lambda n: (0, 0)),        # wi (resident)
                pl.BlockSpec((1, KO), lambda n: (0, 0)),         # bi (resident)
                pl.BlockSpec((Dq, KO), lambda n: (0, 0)),        # wq (resident)
                pl.BlockSpec((1, KO), lambda n: (0, 0)),         # bq (resident)
                pl.BlockSpec((rows, tb), lambda n: (0, 0)),      # S  (resident)
                pl.BlockSpec((rows, rows), lambda n: (0, 0)),    # G  (resident)
                pl.BlockSpec((KO, mfb_o), lambda n: (0, 0)),     # P  (resident)
            ],
            out_specs=[
                pl.BlockSpec((rows, mfb_o), lambda n: (n, 0)),
                pl.BlockSpec((rows, KO), lambda n: (n, 0)),
            ],
        ),
        compiler_params=pltpu.CompilerParams(
            dimension_semantics=("parallel",),
            # Toy sizes fit easily; for production MFB sizes re-derive per chip
            # (tile KO / bf16 weights on v7x's 64 MiB VMEM).
            vmem_limit_bytes=64 * 1024 * 1024,
        ),
    )(img2, ques2, wi_bf, bi, wq_bf, bq, S, G, P)

    return z2.reshape(N, C, mfb_o), exp2.reshape(N, C, KO)


def mfb_reference(img_feat, ques_feat, wi, bi, wq, bq, mfb_k, mfb_o):
    """Pure-JAX reference mirroring the PyTorch forward (eval mode,
    is_first=True) with the same bf16-input / f32-accumulation matmuls."""
    N, C, _ = img_feat.shape
    pi = jnp.dot(img_feat.astype(jnp.bfloat16), wi.astype(jnp.bfloat16),
                 preferred_element_type=jnp.float32) + bi                   # (N, C, KO)
    pq = jnp.dot(ques_feat.astype(jnp.bfloat16), wq.astype(jnp.bfloat16),
                 preferred_element_type=jnp.float32) + bq                   # (N, 1, KO)
    exp_out = pi * pq                                                       # (N, C, KO)
    z = exp_out.reshape(N, C, mfb_o, mfb_k).sum(-1)    # AvgPool1d(K)*K == sum
    z = jnp.where(z >= 0.0, 1.0, -1.0) * jnp.sqrt(jnp.abs(z))
    flat = z.reshape(N, -1)
    sumsq = jnp.sum(flat * flat, axis=1, keepdims=True)
    flat = flat * lax.rsqrt(jnp.maximum(sumsq, 1e-24))
    return flat.reshape(N, C, mfb_o), exp_out


if __name__ == "__main__":
    # Small config consistent with the module's forward contract.
    MFB_K = 4
    MFB_O = 32
    N, C = 32, 4
    IMG_FEAT_SIZE = 64
    QUES_FEAT_SIZE = 64
    KO = MFB_K * MFB_O

    key = jax.random.PRNGKey(0)
    k1, k2, k3, k4, k5, k6 = jax.random.split(key, 6)

    img_feat = jax.random.normal(k1, (N, C, IMG_FEAT_SIZE), dtype=jnp.float32)
    ques_feat = jax.random.normal(k2, (N, 1, QUES_FEAT_SIZE), dtype=jnp.float32)

    # Deterministic Linear params (uniform, like PyTorch's default init bounds),
    # stored transposed as (D_in, K*O) so projection is x @ W + b.
    bound_i = 1.0 / np.sqrt(IMG_FEAT_SIZE)
    bound_q = 1.0 / np.sqrt(QUES_FEAT_SIZE)
    wi = jax.random.uniform(k3, (IMG_FEAT_SIZE, KO), jnp.float32, -bound_i, bound_i)
    bi = jax.random.uniform(k4, (1, KO), jnp.float32, -bound_i, bound_i)
    wq = jax.random.uniform(k5, (QUES_FEAT_SIZE, KO), jnp.float32, -bound_q, bound_q)
    bq = jax.random.uniform(k6, (1, KO), jnp.float32, -bound_q, bound_q)

    z, exp_out = mfb_forward(img_feat, ques_feat, wi, bi, wq, bq, MFB_K, MFB_O)
    jax.block_until_ready((z, exp_out))

    z_ref, exp_ref = mfb_reference(img_feat, ques_feat, wi, bi, wq, bq, MFB_K, MFB_O)
    # bf16 MXU inputs in both kernel and reference -> only accumulation-order
    # differences remain; 2e-3 is generous yet still catches structural bugs.
    np.testing.assert_allclose(np.asarray(exp_out), np.asarray(exp_ref),
                               rtol=2e-3, atol=2e-3)
    np.testing.assert_allclose(np.asarray(z), np.asarray(z_ref),
                               rtol=2e-3, atol=2e-3)

    print("KERNEL_OK")
</pallas_src>

<mosaic_0001>
module attributes {stable_mosaic.version = 11 : i64} {
  func.func @mfb_kernel(%arg0: i32, %arg1: memref<64x64xf32, #tpu.memory_space<vmem>>, %arg2: memref<16x64xf32, #tpu.memory_space<vmem>>, %arg3: memref<64x128xbf16, #tpu.memory_space<vmem>>, %arg4: memref<1x128xf32, #tpu.memory_space<vmem>>, %arg5: memref<64x128xbf16, #tpu.memory_space<vmem>>, %arg6: memref<1x128xf32, #tpu.memory_space<vmem>>, %arg7: memref<64x16xf32, #tpu.memory_space<vmem>>, %arg8: memref<64x64xf32, #tpu.memory_space<vmem>>, %arg9: memref<128x32xf32, #tpu.memory_space<vmem>>, %arg10: memref<64x32xf32, #tpu.memory_space<vmem>>, %arg11: memref<64x128xf32, #tpu.memory_space<vmem>>) attributes {dimension_semantics = [#tpu.dimension_semantics<parallel>], iteration_bounds = array<i64: 2>, scalar_prefetch = 0 : i64, scratch_operands = 0 : i64, tpu.core_type = #tpu.core_type<tc>, window_params = [{transform_indices = @transform_0, window_bounds = array<i64: 64, 64>}, {transform_indices = @transform_1, window_bounds = array<i64: 16, 64>}, {pipeline_mode = #tpu.pipeline_mode<synchronous>, transform_indices = @transform_2, window_bounds = array<i64: 64, 128>}, {pipeline_mode = #tpu.pipeline_mode<synchronous>, transform_indices = @transform_3, window_bounds = array<i64: 1, 128>}, {pipeline_mode = #tpu.pipeline_mode<synchronous>, transform_indices = @transform_4, window_bounds = array<i64: 64, 128>}, {pipeline_mode = #tpu.pipeline_mode<synchronous>, transform_indices = @transform_5, window_bounds = array<i64: 1, 128>}, {pipeline_mode = #tpu.pipeline_mode<synchronous>, transform_indices = @transform_6, window_bounds = array<i64: 64, 16>}, {pipeline_mode = #tpu.pipeline_mode<synchronous>, transform_indices = @transform_7, window_bounds = array<i64: 64, 64>}, {pipeline_mode = #tpu.pipeline_mode<synchronous>, transform_indices = @transform_8, window_bounds = array<i64: 128, 32>}, {transform_indices = @transform_9, window_bounds = array<i64: 64, 32>}, {transform_indices = @transform_10, window_bounds = array<i64: 64, 128>}]} {
    %c0 = arith.constant 0 : index
    %c0_0 = arith.constant 0 : index
    %0 = vector.load %arg1[%c0, %c0_0] : memref<64x64xf32, #tpu.memory_space<vmem>>, vector<64x64xf32>
    %1 = arith.truncf %0 : vector<64x64xf32> to vector<64x64xbf16>
    %c0_1 = arith.constant 0 : index
    %c0_2 = arith.constant 0 : index
    %2 = vector.load %arg2[%c0_1, %c0_2] : memref<16x64xf32, #tpu.memory_space<vmem>>, vector<16x64xf32>
    %3 = arith.truncf %2 : vector<16x64xf32> to vector<16x64xbf16>
    %c0_3 = arith.constant 0 : index
    %c0_4 = arith.constant 0 : index
    %4 = vector.load %arg3[%c0_3, %c0_4] : memref<64x128xbf16, #tpu.memory_space<vmem>>, vector<64x128xbf16>
    %cst = arith.constant dense<0.000000e+00> : vector<64x128xf32>
    %5 = tpu.matmul %1, %4, %cst {dimension_numbers = #tpu.dot_dimension_numbers<[1], [0], [0], [1], [0, 0, 1, 1], [], []>} : vector<64x64xbf16>, vector<64x128xbf16>, vector<64x128xf32> -> vector<64x128xf32>
    %c0_5 = arith.constant 0 : index
    %c0_6 = arith.constant 0 : index
    %6 = vector.load %arg4[%c0_5, %c0_6] : memref<1x128xf32, #tpu.memory_space<vmem>>, vector<1x128xf32>
    %7 = vector.broadcast %6 : vector<1x128xf32> to vector<64x128xf32>
    %8 = arith.addf %5, %7 : vector<64x128xf32>
    %c0_7 = arith.constant 0 : index
    %c0_8 = arith.constant 0 : index
    %9 = vector.load %arg5[%c0_7, %c0_8] : memref<64x128xbf16, #tpu.memory_space<vmem>>, vector<64x128xbf16>
    %cst_9 = arith.constant dense<0.000000e+00> : vector<16x128xf32>
    %10 = tpu.matmul %3, %9, %cst_9 {dimension_numbers = #tpu.dot_dimension_numbers<[1], [0], [0], [1], [0, 0, 1, 1], [], []>} : vector<16x64xbf16>, vector<64x128xbf16>, vector<16x128xf32> -> vector<16x128xf32>
    %c0_10 = arith.constant 0 : index
    %c0_11 = arith.constant 0 : index
    %11 = vector.load %arg6[%c0_10, %c0_11] : memref<1x128xf32, #tpu.memory_space<vmem>>, vector<1x128xf32>
    %12 = vector.broadcast %11 : vector<1x128xf32> to vector<16x128xf32>
    %13 = arith.addf %10, %12 : vector<16x128xf32>
    %c0_12 = arith.constant 0 : index
    %c0_13 = arith.constant 0 : index
    %14 = vector.load %arg7[%c0_12, %c0_13] : memref<64x16xf32, #tpu.memory_space<vmem>>, vector<64x16xf32>
    %cst_14 = arith.constant dense<0.000000e+00> : vector<64x128xf32>
    %15 = tpu.matmul %14, %13, %cst_14 {dimension_numbers = #tpu.dot_dimension_numbers<[1], [0], [0], [1], [0, 0, 1, 1], [], []>} : vector<64x16xf32>, vector<16x128xf32>, vector<64x128xf32> -> vector<64x128xf32>
    %16 = arith.mulf %8, %15 : vector<64x128xf32>
    %c0_15 = arith.constant 0 : index
    %c0_16 = arith.constant 0 : index
    %17 = vector.load %arg11[%c0_15, %c0_16] : memref<64x128xf32, #tpu.memory_space<vmem>>, vector<64x128xf32>
    tpu.vector_store %arg11[%c0_15, %c0_16], %16 {strides = array<i32>} : memref<64x128xf32, #tpu.memory_space<vmem>>, vector<64x128xf32>,
    %c0_17 = arith.constant 0 : index
    %c0_18 = arith.constant 0 : index
    %18 = vector.load %arg9[%c0_17, %c0_18] : memref<128x32xf32, #tpu.memory_space<vmem>>, vector<128x32xf32>
    %cst_19 = arith.constant dense<0.000000e+00> : vector<64x32xf32>
    %19 = tpu.matmul %16, %18, %cst_19 {dimension_numbers = #tpu.dot_dimension_numbers<[1], [0], [0], [1], [0, 0, 1, 1], [], []>} : vector<64x128xf32>, vector<128x32xf32>, vector<64x32xf32> -> vector<64x32xf32>
    %cst_20 = arith.constant 0.000000e+00 : f32
    %20 = vector.broadcast %cst_20 : f32 to vector<64x32xf32>
    %21 = arith.cmpf oge, %19, %20 : vector<64x32xf32>
    %cst_21 = arith.constant 1.000000e+00 : f32
    %cst_22 = arith.constant -1.000000e+00 : f32
    %22 = vector.broadcast %cst_21 : f32 to vector<64x32xf32>
    %23 = vector.broadcast %cst_22 : f32 to vector<64x32xf32>
    %24 = arith.select %21, %22, %23 : vector<64x32xi1>, vector<64x32xf32>
    %25 = math.absf %19 : vector<64x32xf32>
    %26 = math.sqrt %25 : vector<64x32xf32>
    %27 = arith.mulf %24, %26 : vector<64x32xf32>
    %28 = arith.mulf %27, %27 : vector<64x32xf32>
    %c0_23 = arith.constant 0 : index
    %c0_24 = arith.constant 0 : index
    %29 = vector.load %arg8[%c0_23, %c0_24] : memref<64x64xf32, #tpu.memory_space<vmem>>, vector<64x64xf32>
    %cst_25 = arith.constant dense<0.000000e+00> : vector<64x32xf32>
    %30 = tpu.matmul %29, %28, %cst_25 {dimension_numbers = #tpu.dot_dimension_numbers<[1], [0], [0], [1], [0, 0, 1, 1], [], []>} : vector<64x64xf32>, vector<64x32xf32>, vector<64x32xf32> -> vector<64x32xf32>
    %cst_26 = arith.constant dense<0.000000e+00> : vector<64xf32>
    %31 = vector.multi_reduction <add>, %30, %cst_26 [1] : vector<64x32xf32> to vector<64xf32>
    %32 = vector.shape_cast %31 : vector<64xf32> to vector<64x1xf32>
    %cst_27 = arith.constant 1.000000e-24 : f32
    %33 = vector.broadcast %cst_27 : f32 to vector<64x1xf32>
    %34 = arith.maximumf %32, %33 : vector<64x1xf32>
    %35 = math.rsqrt %34 : vector<64x1xf32>
    %36 = vector.broadcast %35 : vector<64x1xf32> to vector<64x32xf32>
    %37 = arith.mulf %27, %36 : vector<64x32xf32>
    %c0_28 = arith.constant 0 : index
    %c0_29 = arith.constant 0 : index
    %38 = vector.load %arg10[%c0_28, %c0_29] : memref<64x32xf32, #tpu.memory_space<vmem>>, vector<64x32xf32>
    tpu.vector_store %arg10[%c0_28, %c0_29], %37 {strides = array<i32>} : memref<64x32xf32, #tpu.memory_space<vmem>>, vector<64x32xf32>,
    return
  }
  func.func @transform_0(%arg0: i32) -> (i32, i32) {
    %c0_i32 = arith.constant 0 : i32
    %c0_i32_0 = arith.constant 0 : i32
    return %arg0, %c0_i32 : i32, i32
  }
  func.func @transform_1(%arg0: i32) -> (i32, i32) {
    %c0_i32 = arith.constant 0 : i32
    %c0_i32_0 = arith.constant 0 : i32
    return %arg0, %c0_i32 : i32, i32
  }
  func.func @transform_2(%arg0: i32) -> (i32, i32) {
    %c0_i32 = arith.constant 0 : i32
    %c0_i32_0 = arith.constant 0 : i32
    %c0_i32_1 = arith.constant 0 : i32
    return %c0_i32, %c0_i32_0 : i32, i32
  }
  func.func @transform_3(%arg0: i32) -> (i32, i32) {
    %c0_i32 = arith.constant 0 : i32
    %c0_i32_0 = arith.constant 0 : i32
    %c0_i32_1 = arith.constant 0 : i32
    return %c0_i32, %c0_i32_0 : i32, i32
  }
  func.func @transform_4(%arg0: i32) -> (i32, i32) {
    %c0_i32 = arith.constant 0 : i32
    %c0_i32_0 = arith.constant 0 : i32
    %c0_i32_1 = arith.constant 0 : i32
    return %c0_i32, %c0_i32_0 : i32, i32
  }
  func.func @transform_5(%arg0: i32) -> (i32, i32) {
    %c0_i32 = arith.constant 0 : i32
    %c0_i32_0 = arith.constant 0 : i32
    %c0_i32_1 = arith.constant 0 : i32
    return %c0_i32, %c0_i32_0 : i32, i32
  }
  func.func @transform_6(%arg0: i32) -> (i32, i32) {
    %c0_i32 = arith.constant 0 : i32
    %c0_i32_0 = arith.constant 0 : i32
    %c0_i32_1 = arith.constant 0 : i32
    return %c0_i32, %c0_i32_0 : i32, i32
  }
  func.func @transform_7(%arg0: i32) -> (i32, i32) {
    %c0_i32 = arith.constant 0 : i32
    %c0_i32_0 = arith.constant 0 : i32
    %c0_i32_1 = arith.constant 0 : i32
    return %c0_i32, %c0_i32_0 : i32, i32
  }
  func.func @transform_8(%arg0: i32) -> (i32, i32) {
    %c0_i32 = arith.constant 0 : i32
    %c0_i32_0 = arith.constant 0 : i32
    %c0_i32_1 = arith.constant 0 : i32
    return %c0_i32, %c0_i32_0 : i32, i32
  }
  func.func @transform_9(%arg0: i32) -> (i32, i32) {
    %c0_i32 = arith.constant 0 : i32
    %c0_i32_0 = arith.constant 0 : i32
    return %arg0, %c0_i32 : i32, i32
  }
  func.func @transform_10(%arg0: i32) -> (i32, i32) {
    %c0_i32 = arith.constant 0 : i32
    %c0_i32_0 = arith.constant 0 : i32
    return %arg0, %c0_i32 : i32, i32
  }
}

</mosaic_0001>

<bundles_post_ra>
// kernel: tpu_custom_call.1
= control target key start
LH: loop header
LB: loop body
LE: loop exit
PB: predicated region body
PF: predicated region fallthrough
CT: control target
= control target key end

     0   :  { %s3110_s0 = inlined_call_operand.hbm [shape: f32[128,64], index: 0, kind: input, shape index: {}]   ;;  %s3111_s1 = inlined_call_operand.hbm [shape: f32[32,64], index: 1, kind: input, shape index: {}]   ;;  %s3112_s2 = inlined_call_operand.hbm [shape: bf16[64,128], index: 2, kind: input, shape index: {}]   ;;  %s3113_s3 = inlined_call_operand.hbm [shape: f32[1,128], index: 3, kind: input, shape index: {}]   ;;  %s3114_s4 = inlined_call_operand.hbm [shape: bf16[64,128], index: 4, kind: input, shape index: {}]   ;;  %s3115_s5 = inlined_call_operand.hbm [shape: f32[1,128], index: 5, kind: input, shape index: {}]   ;;  %s3116_s6 = inlined_call_operand.hbm [shape: f32[64,16], index: 6, kind: input, shape index: {}]   ;;  %s3117_s7 = inlined_call_operand.hbm [shape: f32[64,64], index: 7, kind: input, shape index: {}]   ;;  %s3118_s8 = inlined_call_operand.hbm [shape: f32[128,32], index: 8, kind: input, shape index: {}]   ;;  %s3119_s9 = inlined_call_operand.hbm [shape: f32[128,32], index: 9, kind: output, shape index: {0}]   ;;  %s3120_s10 = inlined_call_operand.hbm [shape: f32[128,128], index: 10, kind: output, shape index: {1}]  }
   0x1   :  { %3131 = sst [smem:[#allocation28_spill]] %s3110_s0 }
   0x2   :  { %3132 = sst [smem:[#allocation29_spill]] %s3112_s2 }
   0x3   :  { %3133 = sst [smem:[#allocation30_spill]] %s3113_s3 }
   0x4   :  { %3134 = sst [smem:[#allocation31_spill]] %s3114_s4 }
   0x5   :  { %3135 = sst [smem:[#allocation32_spill]] %s3115_s5 }
   0x6   :  { %3136 = sst [smem:[#allocation33_spill]] %s3116_s6 }
   0x7   :  { %3137 = sst [smem:[#allocation34_spill]] %s3119_s9 }
   0x8   :  { %3138 = sst [smem:[#allocation35_spill]] %s3120_s10 }
   0x9   :  { %16 = vsyncpa [#allocation3], 0 }
   0xa   :  { %18 = vsyncpa [#allocation3 + $0x1], 0 }
   0xb   :  { %19 = vsyncpa [#allocation6], 0 }
   0xc   :  { %21 = vsyncpa [#allocation6 + $0x1], 0 }
   0xd   :  { %22 = vsyncpa [#allocation9], 0 }
   0xe   :  { %23 = vsyncpa [#allocation12], 0 }
   0xf   :  { %24 = vsyncpa [#allocation15], 0 }
  0x10   :  { %25 = vsyncpa [#allocation4], 0 }
  0x11   :  { %27 = vsyncpa [#allocation4 + $0x1], 0 }
  0x12   :  { %28 = vsyncpa [#allocation19], 0 }
  0x13   :  { %30 = vsyncpa [#allocation19 + $0x1], 0  ;;  %s2469_s13 = smov 0   ;;  %s2471_s14 = smov 0  }
  0x14   :  { %s2473_s15 = smov 0   ;;  %s2475_s16 = smov 0  }
  0x15 LB: > { %s2394_s17 = smov [#allocation7]   ;;  %s2490_s19 = sadd.s32 4294967295, %s2392_s16   ;;  %s2392_s16 = sphi %s2475_s16, %s3174_s16   ;;  %s2388_s15 = sphi %s2473_s15, %s3173_s15   ;;  %s2384_s14 = sphi %s2471_s14, %s3172_s14   ;;  %s2380_s13 = sphi %s2469_s13, %s3171_s13  }
  0x16   : > { %s304_s18 = sshll.u32 %s2394_s17, 4  ;;  %p1541_p0 = scmp.ge.s32.totalorder %s2392_s16, 1  ;;  %s2495_s18 = int_to_ptr.vmem [resolvable:$true] %s304_s18 }
  0x17   : > { %p3124_p1 = scmp.eq.s32.totalorder %s2490_s19, 0  ;;  %p292_p2 = scmp.lt.s32.totalorder %s2392_s16, 3 }
  0x18   : > { %s2395_s21 = smov [#allocation8]   ;;  %s2396_s24 = smov [#allocation11]  }
  0x19   : > { %p2497_p3 = pnand %p1541_p0, %p292_p2  ;;  %s318_s22 = sshll.u32 %s2395_s21, 4  ;;  %s2510_s22 = int_to_ptr.vmem [resolvable:$true] %s318_s22 }
  0x1a   : > { %s342_s25 = sshll.u32 %s2396_s24, 4  ;;  %s3141_s2 = sld [smem:[#allocation29_spill]]  ;;  %s2512_s25 = int_to_ptr.vmem [resolvable:$true] %s342_s25 }
  0x1b   : > { %s3139_s20 = scalar_select %p2497_p3, 1, 0 }
  0x1c   : > { %p1878_p5 = pneg %p2497_p3 }
  0x1e   : > { %p2506_p6 = pnand %p1878_p5, %p3124_p1 }
  0x20   : > { %s2018_s28 = scalar_lea.hbm %s3141_s2, 512  ;;  %p2522_p8 = pneg %p2506_p6 }
  0x21   : > { %p2019_p7 = scmp.ne.s32.totalorder %s3141_s2, %s2018_s28  ;;  %p2025_p11 = scmp.lt.u32.totalorder %s2018_s28, %s3141_s2 }
  0x23   : > { %p2021_p9 = pnand %p2522_p8, %p2019_p7 }
  0x25   : > { %p2022_p10 = pneg %p2021_p9 }
  0x27   : > { %p2027_p12 = pnand %p2025_p11, %p2022_p10 }
  0x29   : > { %2030 = shalt.err (!%p2027_p12)
}
  0x2a   : > { %s2031_s21 = scalar_lea.vmem %s2495_s18, 512  ;;  %p2039_p5 = scmp.lt.s32.totalorder %s2495_s18, %s2495_s18 }
  0x2b   : > { %p2032_p13 = scmp.ne.s32.totalorder %s2495_s18, %s2031_s21  ;;  %p2040_p4 = scmp.lt.s32.totalorder %s2031_s21, %s2031_s21 }
  0x2d   : > { %p2034_p0 = pnand %p2032_p13, %p2522_p8  ;;  %p2041_p7 = por %p2040_p4, %p2039_p5 }
  0x2f   : > { %p2035_p2 = pneg %p2034_p0 }
  0x31   : > { %p2042_p9 = pnand %p2041_p7, %p2035_p2 }
  0x33   : > { %2045 = shalt.err (!%p2042_p9)
}
  0x34   : > { %s3123_s24 = smov 64   ;;  %s2398_s26 = smov 4  }
  0x35   : > { %1881 = dma.hbm_to_vmem [thread:$0]  (!%p2506_p6), %s3141_s2, 512, %s2495_s18, [#allocation6], %s3123_s24, %s3123_s24, %s2398_s26  }
  0x36   : > { %s3143_s3 = sld [smem:[#allocation30_spill]] }
  0x3c   : > { %s2046_s12 = scalar_lea.hbm %s3143_s3, 16 }
  0x3d   : > { %p2047_p4 = scmp.ne.s32.totalorder %s3143_s3, %s2046_s12  ;;  %p2053_p12 = scmp.lt.u32.totalorder %s2046_s12, %s3143_s3 }
  0x3f   : > { %p2049_p10 = pnand %p2047_p4, %p2522_p8 }
  0x41   : > { %p2050_p11 = pneg %p2049_p10 }
  0x43   : > { %p2055_p13 = pnand %p2053_p12, %p2050_p11 }
  0x45   : > { %2058 = shalt.err (!%p2055_p13)
}
  0x46   : > { %s2059_s18 = scalar_lea.vmem %s2510_s22, 16  ;;  %s2066_s27 = scalar_lea.vmem %s2510_s22, 32 }
  0x47   : > { %p2060_p0 = scmp.ne.s32.totalorder %s2510_s22, %s2059_s18  ;;  %p2067_p7 = scmp.lt.s32.totalorder %s2510_s22, %s2510_s22 }
  0x48   : > { %p2068_p9 = scmp.lt.s32.totalorder %s2066_s27, %s2059_s18 }
  0x49   : > { %p2062_p2 = pnand %p2060_p0, %p2522_p8 }
  0x4a   : > { %p2069_p4 = por %p2068_p9, %p2067_p7 }
  0x4b   : > { %p2063_p5 = pneg %p2062_p2 }
  0x4d   : > { %p2070_p10 = pnand %p2069_p4, %p2063_p5 }
  0x4f   : > { %2073 = shalt.err (!%p2070_p10)
}
  0x50   : > { %1884 = dma.hbm_to_vmem [thread:$0]  (!%p2506_p6), %s3143_s3, 16, %s2510_s22, [#allocation9]  }
  0x51   : > { %s3144_s5 = sld [smem:[#allocation32_spill]] }
  0x57   : > { %s2074_s30 = scalar_lea.hbm %s3144_s5, 16 }
  0x58   : > { %p2075_p11 = scmp.ne.s32.totalorder %s3144_s5, %s2074_s30  ;;  %p2081_p0 = scmp.lt.u32.totalorder %s2074_s30, %s3144_s5 }
  0x5a   : > { %p2077_p12 = pnand %p2075_p11, %p2522_p8 }
  0x5c   : > { %p2078_p13 = pneg %p2077_p12 }
  0x5e   : > { %p2083_p2 = pnand %p2081_p0, %p2078_p13 }
  0x60   : > { %2086 = shalt.err (!%p2083_p2)
}
  0x61   : > { %s2087_s22 = scalar_lea.vmem %s2512_s25, 16  ;;  %s2094_s27 = scalar_lea.vmem %s2512_s25, 32 }
  0x62   : > { %p2088_p5 = scmp.ne.s32.totalorder %s2512_s25, %s2087_s22  ;;  %p2095_p4 = scmp.lt.s32.totalorder %s2512_s25, %s2512_s25 }
  0x63   : > { %p2096_p10 = scmp.lt.s32.totalorder %s2094_s27, %s2087_s22 }
  0x64   : > { %p2090_p7 = pnand %p2088_p5, %p2522_p8 }
  0x65   : > { %p2097_p11 = por %p2096_p10, %p2095_p4 }
  0x66   : > { %p2091_p9 = pneg %p2090_p7 }
  0x68   : > { %p2098_p12 = pnand %p2097_p11, %p2091_p9 }
  0x6a   : > { %2101 = shalt.err (!%p2098_p12)
}
  0x6b   : > { %1890 = dma.hbm_to_vmem [thread:$0]  (!%p2506_p6), %s3144_s5, 16, %s2512_s25, [#allocation12]  }
  0x6c   : > { %s2399_s28 = smov [#allocation14]   ;;  %s2400_s30 = smov [#allocation10]  }
  0x6d   : > { %s365_s29 = sshll.u32 %s2399_s28, 4  ;;  %s328_s12 = sshll.u32 %s2400_s30, 4  ;;  %s366_s29 = int_to_ptr.vmem [resolvable:$true] %s365_s29  ;;  %s329_s12 = int_to_ptr.vmem [resolvable:$true] %s328_s12 }
  0x6e   : > { %s2102_s18 = scalar_lea.hbm %s3117_s7, 1024 }
  0x6f   : > { %p2103_p13 = scmp.ne.s32.totalorder %s3117_s7, %s2102_s18  ;;  %p2109_p5 = scmp.lt.u32.totalorder %s2102_s18, %s3117_s7 }
  0x71   : > { %p2105_p0 = pnand %p2103_p13, %p2522_p8 }
  0x73   : > { %p2106_p2 = pneg %p2105_p0 }
  0x75   : > { %p2111_p7 = pnand %p2109_p5, %p2106_p2 }
  0x77   : > { %2114 = shalt.err (!%p2111_p7)
}
  0x78   : > { %s2115_s25 = scalar_lea.vmem %s366_s29, 1024  ;;  %p2123_p11 = scmp.lt.s32.totalorder %s366_s29, %s366_s29 }
  0x79   : > { %p2116_p9 = scmp.ne.s32.totalorder %s366_s29, %s2115_s25  ;;  %p2124_p12 = scmp.lt.s32.totalorder %s2115_s25, %s2115_s25 }
  0x7b   : > { %p2118_p4 = pnand %p2116_p9, %p2522_p8  ;;  %p2125_p1 = por %p2124_p12, %p2123_p11 }
  0x7d   : > { %p2119_p10 = pneg %p2118_p4 }
  0x7f   : > { %p2126_p3 = pnand %p2125_p1, %p2119_p10 }
  0x81   : > { %2129 = shalt.err (!%p2126_p3)
}
  0x82   : > { %s3126_s10 = smov 128   ;;  %s3128_s28 = smov 8  }
  0x83   : > { %1896 = dma.hbm_to_vmem [thread:$0]  (!%p2506_p6), %s3117_s7, 1024, %s366_s29, [#allocation15], %s3126_s10, %s3126_s10, %s3128_s28  }
  0x84   : > { %s3145_s4 = sld [smem:[#allocation31_spill]] }
  0x8a   : > { %s2130_s18 = scalar_lea.hbm %s3145_s4, 512 }
  0x8b   : > { %p2131_p1 = scmp.ne.s32.totalorder %s3145_s4, %s2130_s18  ;;  %p2137_p0 = scmp.lt.u32.totalorder %s2130_s18, %s3145_s4 }
  0x8d   : > { %p2133_p3 = pnand %p2131_p1, %p2522_p8 }
  0x8f   : > { %p2134_p13 = pneg %p2133_p3 }
  0x91   : > { %p2139_p2 = pnand %p2137_p0, %p2134_p13 }
  0x93   : > { %2142 = shalt.err (!%p2139_p2)
}
  0x94   : > { %s2143_s24 = scalar_lea.vmem %s329_s12, 512  ;;  %p2151_p4 = scmp.lt.s32.totalorder %s329_s12, %s329_s12 }
  0x95   : > { %p2144_p5 = scmp.ne.s32.totalorder %s329_s12, %s2143_s24  ;;  %p2152_p10 = scmp.lt.s32.totalorder %s2143_s24, %s2143_s24 }
  0x97   : > { %p2146_p7 = pnand %p2144_p5, %p2522_p8  ;;  %p2153_p11 = por %p2152_p10, %p2151_p4 }
  0x99   : > { %p2147_p9 = pneg %p2146_p7 }
  0x9b   : > { %p2154_p12 = pnand %p2153_p11, %p2147_p9 }
  0x9d   : > { %2157 = shalt.err (!%p2154_p12)
}
  0x9e   : > { %s3146_s29 = smov 64   ;;  %s2403_s21 = smov [#allocation13]  }
  0x9f   : > { %1887 = dma.hbm_to_vmem [thread:$0]  (!%p2506_p6), %s3145_s4, 512, %s329_s12, [#allocation9], %s3146_s29, %s3146_s29, %s2398_s26  }
  0xa0   : > { %s352_s18 = sshll.u32 %s2403_s21, 4  ;;  %s2404_s22 = smov [#allocation16]   ;;  %s353_s18 = int_to_ptr.vmem [resolvable:$true] %s352_s18 }
  0xa1   : > { %s378_s27 = sshll.u32 %s2404_s22, 4  ;;  %s3147_s6 = sld [smem:[#allocation33_spill]]  ;;  %s379_s27 = int_to_ptr.vmem [resolvable:$true] %s378_s27 }
  0xa7   : > { %s2158_s24 = scalar_lea.hbm %s3147_s6, 1024 }
  0xa8   : > { %p2159_p1 = scmp.ne.s32.totalorder %s3147_s6, %s2158_s24  ;;  %p2165_p0 = scmp.lt.u32.totalorder %s2158_s24, %s3147_s6 }
  0xaa   : > { %p2161_p3 = pnand %p2159_p1, %p2522_p8 }
  0xac   : > { %p2162_p13 = pneg %p2161_p3 }
  0xae   : > { %p2167_p2 = pnand %p2165_p0, %p2162_p13 }
  0xb0   : > { %2170 = shalt.err (!%p2167_p2)
}
  0xb1   : > { %s2171_s26 = scalar_lea.vmem %s353_s18, 1024  ;;  %p2179_p4 = scmp.lt.s32.totalorder %s353_s18, %s353_s18 }
  0xb2   : > { %p2172_p5 = scmp.ne.s32.totalorder %s353_s18, %s2171_s26  ;;  %p2180_p10 = scmp.lt.s32.totalorder %s2171_s26, %s2171_s26 }
  0xb4   : > { %p2174_p7 = pnand %p2172_p5, %p2522_p8  ;;  %p2181_p11 = por %p2180_p10, %p2179_p4 }
  0xb6   : > { %p2175_p9 = pneg %p2174_p7 }
  0xb8   : > { %p2182_p12 = pnand %p2181_p11, %p2175_p9 }
  0xba   : > { %2185 = shalt.err (!%p2182_p12)
}
  0xbb   : > { %s3148_s12 = smov 8   ;;  %s3149_s10 = smov 128  }
  0xbc   : > { %1893 = dma.hbm_to_vmem [thread:$0]  (!%p2506_p6), %s3147_s6, 1024, %s353_s18, [#allocation12], %s3149_s10, %s3149_s10, %s3148_s12  }
  0xbd   : > { %s2186_s21 = scalar_lea.hbm %s3118_s8, 2048 }
  0xbe   : > { %p2187_p1 = scmp.ne.s32.totalorder %s3118_s8, %s2186_s21  ;;  %p2193_p0 = scmp.lt.u32.totalorder %s2186_s21, %s3118_s8 }
  0xc0   : > { %p2189_p3 = pnand %p2187_p1, %p2522_p8 }
  0xc2   : > { %p2190_p13 = pneg %p2189_p3 }
  0xc4   : > { %p2195_p2 = pnand %p2193_p0, %p2190_p13 }
  0xc6   : > { %2198 = shalt.err (!%p2195_p2)
}
  0xc7   : > { %s2199_s30 = scalar_lea.vmem %s379_s27, 2048  ;;  %p2207_p4 = scmp.lt.s32.totalorder %s379_s27, %s379_s27 }
  0xc8   : > { %p2200_p5 = scmp.ne.s32.totalorder %s379_s27, %s2199_s30  ;;  %p2208_p10 = scmp.lt.s32.totalorder %s2199_s30, %s2199_s30 }
  0xca   : > { %p2202_p7 = pnand %p2200_p5, %p2522_p8  ;;  %p2209_p11 = por %p2208_p10, %p2207_p4 }
  0xcc   : > { %p2203_p9 = pneg %p2202_p7 }
  0xce   : > { %p2210_p12 = pnand %p2209_p11, %p2203_p9 }
  0xd0   : > { %2213 = shalt.err (!%p2210_p12)
}
  0xd1   : > { %1899 = dma.hbm_to_vmem [thread:$0]  (!%p2506_p6), %s3118_s8, 2048, %s379_s27, [#allocation15], %s3149_s10, %s3149_s10, %s3148_s12  }
  0xd2   : > { %s1540_s23 = sadd.s32 4294967294, %s2392_s16   ;;  %s2680_s11 = sadd.s32 1, %s2392_s16  }
  0xd3   : > { %s43_s2 = sadd.s32 1, %s2388_s15  ;;  %s40_s28 = ssub.s32 %s2392_s16, %s2680_s11 }
  0xd4   : > { %p50_p8 = scmp.ne.s32.totalorder %s2388_s15, %s2384_s14  ;;  %p41_p1 = scmp.eq.s32.totalorder %s40_s28, 0 }
  0xd5   : > { %p51_p3 = scmp.eq.s32.totalorder %s2392_s16, 0  ;;  %p56_p13 = scmp.ne.s32.totalorder %s2384_s14, %s2380_s13 }
  0xd6   : > { %p253_p0 = scmp.eq.s32.totalorder %s2490_s19, 1  ;;  %p3150_p5 = scmp.eq.s32.totalorder %s2490_s19, 0 }
  0xd7   : > { %s2692_s29 = scalar_select %p41_p1, %s2388_s15, %s43_s2  }
  0xd8   : > { %p52_p2 = por %p51_p3, %p50_p8  ;;  %p2696_p7 = por %p3150_p5, %p56_p13 }
  0xd9   : > { %p2700_p6 = por %p253_p0, %p50_p8  ;;  %p259_p9 = scmp.eq.s32.totalorder %s1540_s23, 1 }
  0xda   : > { %p1921_p4 = scmp.lt.s32.totalorder %s2392_s16, 2  ;;  %s2706_s21 = sand.u32 1, %s2388_s15  }
  0xdb   : > { %s3152_s17 = scalar_select %p2700_p6, 1, 0 }
  0xdc   : > { %p2708_p10 = por %p259_p9, %p56_p13  ;;  %s1550_s9 = sshll.u32 %s2706_s21, 6 }
  0xdd   : > { %s1607_s25 = sshll.u32 %s2392_s16, 10  ;;  %s3154_s0 = sld [smem:[#allocation28_spill]] }
  0xde   : > { %s3153_s22 = scalar_select %p2708_p10, 1, 0 }
  0xdf   : > { %s396_s26 = scalar_lea.vmem [#allocation2], %s1550_s9  ;;  %p2719_p11 = pnand %p1921_p4, %p52_p2 }
  0xe0   : > { %s403_s23 = sshll.u32 %s396_s26, 4  ;;  %s393_s3 = scalar_lea.sflag [#allocation3], %s2706_s21  ;;  %s2723_s23 = int_to_ptr.vmem [resolvable:$true] %s403_s23 }
  0xe1   : > { %p2216_p8 = pneg %p2719_p11 }
  0xe3   : > { %s2717_s18 = scalar_lea.hbm %s3154_s0, %s1607_s25  ;;  %s2219_s24 = scalar_lea.hbm %s3154_s0, 2048 }
  0xe4   : > { %s2214_s4 = scalar_lea.hbm %s2717_s18, 1024  ;;  %p2220_p13 = scmp.lt.u32.totalorder %s2717_s18, %s3154_s0 }
  0xe5   : > { %p2215_p12 = scmp.ne.s32.totalorder %s2717_s18, %s2214_s4  ;;  %p2221_p0 = scmp.lt.u32.totalorder %s2219_s24, %s2214_s4 }
  0xe6   : > { %p2223_p5 = scmp.lt.u32.totalorder %s2214_s4, %s2717_s18 }
  0xe7   : > { %p2217_p1 = pnand %p2216_p8, %p2215_p12  ;;  %p2222_p2 = por %p2221_p0, %p2220_p13 }
  0xe9   : > { %p2218_p3 = pneg %p2217_p1  ;;  %p2224_p9 = por %p2223_p5, %p2222_p2 }
  0xeb   : > { %p2225_p4 = pnand %p2224_p9, %p2218_p3 }
  0xed   : > { %2228 = shalt.err (!%p2225_p4)
}
  0xee   : > { %s2229_s28 = scalar_lea.vmem %s2723_s23, 1024  ;;  %s2405_s9 = smov [#allocation2]  }
  0xef   : > { %p2230_p12 = scmp.ne.s32.totalorder %s2723_s23, %s2229_s28  ;;  %s2234_s25 = sshll.u32 %s2405_s9, 4  ;;  %s2235_s25 = int_to_ptr.vmem [resolvable:$false] %s2234_s25 }
  0xf0   : > { %s2236_s30 = scalar_lea.vmem %s2235_s25, 2048  ;;  %p2237_p6 = scmp.lt.s32.totalorder %s2723_s23, %s2235_s25 }
  0xf1   : > { %p2232_p1 = pnand %p2230_p12, %p2216_p8  ;;  %p2238_p13 = scmp.lt.s32.totalorder %s2236_s30, %s2229_s28 }
  0xf3   : > { %p2233_p10 = pneg %p2232_p1  ;;  %p2239_p0 = por %p2238_p13, %p2237_p6 }
  0xf5   : > { %p2240_p2 = pnand %p2239_p0, %p2233_p10 }
  0xf7   : > { %2243 = shalt.err (!%p2240_p2)
}
  0xf8   : > { %1903 = dma.hbm_to_vmem [thread:$0]  (!%p2719_p11), %s2717_s18, 1024, %s2723_s23, %s393_s3, %s3149_s10, %s3149_s10, %s3148_s12  }
  0xf9   : > { %s1553_s4 = sshll.u32 %s2706_s21, 4  ;;  %s1608_s24 = sshll.u32 %s2392_s16, 8 }
  0xfa   : > { %s2762_s9 = scalar_lea.hbm %s3111_s1, %s1608_s24  ;;  %s417_s25 = scalar_lea.vmem [#allocation5], %s1553_s4 }
  0xfb   : > { %s424_s30 = sshll.u32 %s417_s25, 4  ;;  %s3156_s0 = sand.u32 1, %s2392_s16   ;;  %s2764_s30 = int_to_ptr.vmem [resolvable:$true] %s424_s30 }
  0xfc   : > { %s2768_s5 = scalar_lea.sflag [#allocation6], %s3156_s0  ;;  %s2244_s6 = scalar_lea.hbm %s2762_s9, 256 }
  0xfd   : > { %p2245_p6 = scmp.ne.s32.totalorder %s2762_s9, %s2244_s6  ;;  %s2249_s18 = scalar_lea.hbm %s3111_s1, 512 }
  0xfe   : > { %p2250_p5 = scmp.lt.u32.totalorder %s2762_s9, %s3111_s1  ;;  %p2251_p9 = scmp.lt.u32.totalorder %s2249_s18, %s2244_s6 }
  0xff   : > { %p2247_p10 = pnand %p2245_p6, %p2216_p8  ;;  %p2253_p12 = scmp.lt.u32.totalorder %s2244_s6, %s2762_s9 }
 0x100   : > { %p2252_p4 = por %p2251_p9, %p2250_p5 }
 0x101   : > { %p2248_p3 = pneg %p2247_p10 }
 0x102   : > { %p2254_p1 = por %p2253_p12, %p2252_p4 }
 0x104   : > { %p2255_p13 = pnand %p2254_p1, %p2248_p3 }
 0x106   : > { %2258 = shalt.err (!%p2255_p13)
}
 0x107   : > { %s2259_s0 = scalar_lea.vmem %s2764_s30, 256  ;;  %s2406_s4 = smov [#allocation5]  }
 0x108   : > { %p2260_p0 = scmp.ne.s32.totalorder %s2764_s30, %s2259_s0  ;;  %s2264_s28 = sshll.u32 %s2406_s4, 4  ;;  %s2265_s28 = int_to_ptr.vmem [resolvable:$false] %s2264_s28 }
 0x109   : > { %s2266_s26 = scalar_lea.vmem %s2265_s28, 512  ;;  %p2267_p10 = scmp.lt.s32.totalorder %s2764_s30, %s2265_s28 }
 0x10a   : > { %p2262_p2 = pnand %p2260_p0, %p2216_p8  ;;  %p2268_p5 = scmp.lt.s32.totalorder %s2266_s26, %s2259_s0 }
 0x10c   : > { %p2263_p6 = pneg %p2262_p2  ;;  %p2269_p9 = por %p2268_p5, %p2267_p10 }
 0x10e   : > { %p2270_p4 = pnand %p2269_p9, %p2263_p6 }
 0x110   : > { %2273 = shalt.err (!%p2270_p4)
}
 0x111   : > { %1906 = dma.hbm_to_vmem [thread:$0]  (!%p2719_p11), %s2762_s9, 256, %s2764_s30, %s2768_s5, %s3149_s10, %s3149_s10, %s3148_s12  }
 0x112   : > { %p3157_p8 = scmp.ne.s32.totalorder %s3139_s20, 0 }
 0x113   : > { %s2800_s6 = sand.u32 (!%p3157_p8), 1, %s2384_s14  }
 0x114   : > { %436 = sbr.rel (%p3157_p8) target bundleno = 1407 (0x57f), region = 56  ;;  %s2803_s25 = sshll.u32 (!%p3157_p8), %s2800_s6, 6 }
 0x115   : > { %s439_s2 = scalar_lea.sflag (!%p3157_p8), [#allocation3], %s2800_s6  ;;  %s2807_s3 = scalar_lea.vmem (!%p3157_p8), [#allocation2], %s2803_s25 }
 0x11b   : > { %2347 = dma.done.wait (%p2696_p7), %s439_s2, 1024  }
 0x11c   : > { %2349 = vsyncadd (%p2696_p7), %s439_s2, 4294966272  ;;  %s447_s5 = sand.u32 1, %s2490_s19   ;;  %s1558_s20 = sshll.u32 %s2800_s6, 4 }
 0x11d   : > { %s448_s12 = scalar_lea.sflag [#allocation6], %s447_s5  ;;  %s2815_s10 = scalar_lea.vmem [#allocation5], %s1558_s20 }
 0x11e   : > { %2351 = dma.done.wait (%p2696_p7), %s448_s12, 256  }
 0x11f   : > { %2353 = vsyncadd (%p2696_p7), %s448_s12, 4294967040  ;;  %p3158_p11 = scmp.eq.s32.totalorder %s2490_s19, 0 }
 0x121   : > { %2355 = dma.done.wait (%p3158_p11), [#allocation6], 512   ;;  %p3159_p3 = pmov %p3158_p11 }
 0x123   : > { %2357 = vsyncadd (%p3159_p3), [#allocation6], 4294966784  ;;  %p3160_p12 = pmov %p3159_p3 }
 0x124   : > { %p3161_p1 = pmov %p3159_p3 }
 0x125   : > { %2359 = dma.done.wait (%p3160_p12), [#allocation9], 528  }
 0x126   : > { %2361 = vsyncadd (%p3161_p1), [#allocation9], 4294966768  ;;  %p3162_p13 = pmov %p3161_p1 }
 0x127   : > { %p3163_p0 = pmov %p3161_p1 }
 0x128   : > { %2363 = dma.done.wait (%p3162_p13), [#allocation12], 1040  }
 0x129   : > { %2365 = vsyncadd (%p3163_p0), [#allocation12], 4294966256  ;;  %p3164_p7 = pmov %p3163_p0 }
 0x12a   : > { %p3165_p2 = pmov %p3163_p0 }
 0x12b   : > { %2367 = dma.done.wait (%p3164_p7), [#allocation15], 3072  }
 0x12c   : > { %2369 = vsyncadd (%p3165_p2), [#allocation15], 4294964224  ;;  %v2407_v0 = vmov 0.0   ;;  %vm2408_vm0 = vmmov 0   ;;  %v1978_v1 = vld [vmem:[#allocation10] sm:$0xff]   ;;  %v1979_v2 = vld [vmem:[#allocation10 + $0x8] sm:$0xff]  }
 0x12d   : > { %1690 = vmatprep.subr.bf16.mxu1 %v2407_v0  ;;  %1698 = vmatprep.mubr.msk.bf16.mxu1 %vm2408_vm0, %v2407_v0  ;;  %v1980_v3 = vld [vmem:[#allocation10 + $0x10] sm:$0xff]   ;;  %v1982_v4 = vld [vmem:[#allocation7] sm:$0xff]   ;;  %v1983_v5 = vld [vmem:[#allocation7 + $0x8] sm:$0xff]   ;;  %vm585_vm1 = vcmask 523264   ;;  %vm754_vm2 = vcmask 130048   ;;  %s2861_s27 = scalar_lea.vmem [#allocation18], %s2803_s25 }
 0x12e   : > { %1691 = vmatpush3.bf16.msra.mxu1 %v1978_v1  ;;  %1674 = vmatprep.subr.bf16.mxu0 %v1982_v4  ;;  %v1984_v6 = vld [vmem:[#allocation7 + $0x10] sm:$0xff]   ;;  %v1981_v7 = vld [vmem:[#allocation10 + $0x18] sm:$0xff]   ;;  %v532_v13 = vld [vmem:[%s2807_s3 + $0x8] sm:$0xff]  ;;  %s1346_s9 = sshll.u32 %s2861_s27, 4  ;;  %s1609_s30 = sshll.u32 %s2490_s19, 10  ;;  %s3003_s9 = int_to_ptr.vmem [resolvable:$true] %s1346_s9 }
 0x12f   : > { %1692 = vmatprep.subr.bf16.mxu1 %v2407_v0  ;;  %1675 = vmatpush3.bf16.msra.mxu0 %v1982_v4  ;;  %v543_v8 = vld [vmem:[%s2815_s10] sm:$0xff]  ;;  %v544_v9 = vld [vmem:[%s2815_s10 + $0x8] sm:$0xff]  ;;  %s3166_s23 = sld [smem:[#allocation35_spill]]  ;;  %s1317_s0 = scalar_lea.sflag [#allocation19], %s2800_s6 }
 0x130   : > { %1676 = vmatprep.subr.bf16.mxu0 %v1983_v5  ;;  %v545_v10 = vpack.c.bf16 %v544_v9, %v543_v8  ;;  %v1985_v11 = vld [vmem:[#allocation7 + $0x18] sm:$0xff]   ;;  %v531_v12 = vld [vmem:[%s2807_s3] sm:$0xff]  ;;  %v533_v15 = vld [vmem:[%s2807_s3 + $0x10] sm:$0xff]  ;;  %s2274_s4 = scalar_lea.vmem %s3003_s9, 1024  ;;  %p3167_p10 = scmp.ne.s32.totalorder %s3152_s17, 0 }
 0x131   : > { %v539_v14 = vpack.c.bf16 %v532_v13, %v531_v12  ;;  %v534_v16 = vld [vmem:[%s2807_s3 + $0x18] sm:$0xff]  ;;  %v746_v18 = vld [vmem:[#allocation13] sm:$0xff]  ;;  %v537_v22 = vld [vmem:[%s2807_s3 + $0x30] sm:$0xff]  ;;  %p2275_p6 = scmp.ne.s32.totalorder %s3003_s9, %s2274_s4  ;;  %s2410_s28 = smov [#allocation18]  }
 0x132   : > { %1693 = vmatpush3.bf16.msra.mxu1 %v1979_v2  ;;  %v540_v17 = vpack.c.bf16 %v534_v16, %v533_v15  ;;  %v535_v19 = vld [vmem:[%s2807_s3 + $0x20] sm:$0xff]  ;;  %v536_v20 = vld [vmem:[%s2807_s3 + $0x28] sm:$0xff]  ;;  %v538_v23 = vld [vmem:[%s2807_s3 + $0x38] sm:$0xff]  ;;  %s2278_s26 = sshll.u32 %s2410_s28, 4  ;;  %s2279_s26 = int_to_ptr.vmem [resolvable:$false] %s2278_s26 }
 0x133   : > { %1694 = vmatprep.subr.bf16.mxu1 %v2407_v0  ;;  %1677 = vmatpush3.bf16.msra.mxu0 %v1983_v5  ;;  %v541_v21 = vpack.c.bf16 %v536_v20, %v535_v19  ;;  %v542_v24 = vpack.c.bf16 %v538_v23, %v537_v22  ;;  %v900_v25 = vld [vmem:[#allocation16] sm:$0xff]  ;;  %v901_v26 = vld [vmem:[#allocation16 + $0x8] sm:$0xff]  ;;  %v902_v27 = vld [vmem:[#allocation16 + $0x10] sm:$0xff]  ;;  %p2276_p5 = pnand %p2275_p6, %p3167_p10  ;;  %s2280_s2 = scalar_lea.vmem %s2279_s26, 2048 }
 0x134   : > { %1678 = vmatprep.subr.bf16.mxu0 %v1984_v6  ;;  %1682 = vmatprep.mubr.msk.bf16.mxu0 %vm585_vm1, %v539_v14  ;;  %v1794_v28 = vpack.c.bf16 %v901_v26, %v900_v25  ;;  %v903_v29 = vld [vmem:[#allocation16 + $0x18] sm:$0xff]  ;;  %v904_v31 = vld [vmem:[#allocation16 + $0x20] sm:$0xff]  ;;  %v905_v32 = vld [vmem:[#allocation16 + $0x28] sm:$0xff]  ;;  %p2281_p4 = scmp.lt.s32.totalorder %s3003_s9, %s2279_s26  ;;  %p2282_p8 = scmp.lt.s32.totalorder %s2280_s2, %s2274_s4 }
 0x135   : > { %v1798_v30 = vpack.c.bf16 %v903_v29, %v902_v27  ;;  %v1802_v33 = vpack.c.bf16 %v905_v32, %v904_v31  ;;  %v906_v34 = vld [vmem:[#allocation16 + $0x30] sm:$0xff]  ;;  %v907_v35 = vld [vmem:[#allocation16 + $0x38] sm:$0xff]  ;;  %v908_v37 = vld [vmem:[#allocation16 + $0x40] sm:$0xff]  ;;  %s3010_s24 = scalar_lea.hbm %s3166_s23, %s1609_s30  ;;  %p2277_p9 = pneg %p2276_p5 }
 0x136   : > { %1695 = vmatpush3.bf16.msra.mxu1 %v1980_v3  ;;  %v1806_v36 = vpack.c.bf16 %v907_v35, %v906_v34  ;;  %v909_v38 = vld [vmem:[#allocation16 + $0x48] sm:$0xff]  ;;  %v910_v40 = vld [vmem:[#allocation16 + $0x50] sm:$0xff]  ;;  %v911_v41 = vld [vmem:[#allocation16 + $0x58] sm:$0xff]  ;;  %p2283_p11 = por %p2282_p8, %p2281_p4 }
 0x137   : > { %1696 = vmatprep.subr.bf16.mxu1 %v2407_v0  ;;  %1679 = vmatpush3.bf16.msra.mxu0 %v1984_v6  ;;  %v1810_v39 = vpack.c.bf16 %v909_v38, %v908_v37  ;;  %v1814_v42 = vpack.c.bf16 %v911_v41, %v910_v40  ;;  %v912_v43 = vld [vmem:[#allocation16 + $0x60] sm:$0xff]  ;;  %v913_v44 = vld [vmem:[#allocation16 + $0x68] sm:$0xff]  ;;  %v1577_v46 = vld [vmem:[#allocation11] ss:$0 sm:$0xff] }
 0x138   : > { %1680 = vmatprep.subr.bf16.mxu0 %v1985_v11  ;;  %v1818_v45 = vpack.c.bf16 %v913_v44, %v912_v43  ;;  %v747_v54 = vld [vmem:[#allocation13 + $0x8] sm:$0xff]  ;;  %v748_v55 = vld [vmem:[#allocation13 + $0x10] sm:$0xff]  ;;  %v749_v56 = vld [vmem:[#allocation13 + $0x18] sm:$0xff]  ;;  %v2409_v43 = vmov -1.0   ;;  %p2284_p3 = pnand %p2283_p11, %p2277_p9 }
 0x139   : > { %v750_v57 = vld [vmem:[#allocation13 + $0x20] sm:$0xff]  ;;  %v751_v58 = vld [vmem:[#allocation13 + $0x28] sm:$0xff]  ;;  %v752_v59 = vld [vmem:[#allocation13 + $0x30] sm:$0xff] }
 0x13a   : > { %1697 = vmatpush3.bf16.msra.mxu1 %v1981_v7  ;;  %v753_v60 = vld [vmem:[#allocation13 + $0x38] sm:$0xff]  ;;  %v914_v1 = vld [vmem:[#allocation16 + $0x70] sm:$0xff] }
 0x13b   : > { %1681 = vmatpush3.bf16.msra.mxu0 %v1985_v11  ;;  %v915_v2 = vld [vmem:[#allocation16 + $0x78] sm:$0xff] }
 0x13c   : > { %1795 = vmatprep.subr.bf16.mxu0 %v1794_v28  ;;  %v1822_v3 = vpack.c.bf16 %v915_v2, %v914_v1  ;;  %v1568_v8 = vld [vmem:[#allocation8] ss:$0 sm:$0xff] }
 0x13d   : > { %1699 = vmatmul.mubr.msk.bf16.vlgmr.msra.gmra.mrb[0].mxu1 %vm585_vm1, %v545_v10 }
 0x13e   : > { %1683 = vmatmul.mubr.msk.bf16.vlgmr.msra.gmra.mrb[0].mxu0 %vm585_vm1, %v540_v17  ;;  %1706 = vmatprep.mubr.msk.f32.mxu1 %vm754_vm2, %v746_v18 }
 0x13f   : > { %1686 = vmatprep.mubr.msk.bf16.mxu0 %vm585_vm1, %v541_v21  ;;  %1797 = vmatpush3.bf16.msra.mxu0 %v1794_v28 }
 0x140   : > { %1799 = vmatprep.subr.bf16.mxu0 %v1798_v30 }
 0x143   : > { %1801 = vmatpush3.bf16.msra.mxu0 %v1798_v30 }
 0x144   : > { %1803 = vmatprep.subr.bf16.mxu0 %v1802_v33 }
 0x146   : > { %1687 = vmatmul.mubr.msk.bf16.gmra.mrb[4].mxu0 %vm585_vm1, %v542_v24 }
 0x147   : > { %1805 = vmatpush3.bf16.msra.mxu0 %v1802_v33  ;;  %v1117_v33 = vld [vmem:[#allocation14] sm:$0xff] }
 0x148   : > { %1807 = vmatprep.subr.bf16.mxu0 %v1806_v36 }
 0x14b   : > { %1809 = vmatpush3.bf16.msra.mxu0 %v1806_v36 }
 0x14c   : > { %1811 = vmatprep.subr.bf16.mxu0 %v1810_v39 }
 0x14f   : > { %1813 = vmatpush3.bf16.msra.mxu0 %v1810_v39 }
 0x150   : > { %1815 = vmatprep.subr.bf16.mxu0 %v1814_v42 }
 0x153   : > { %1817 = vmatpush3.bf16.msra.mxu0 %v1814_v42 }
 0x154   : > { %1819 = vmatprep.subr.bf16.mxu0 %v1818_v45 }
 0x157   : > { %1821 = vmatpush3.bf16.msra.mxu0 %v1818_v45 }
 0x158   : > { %1823 = vmatprep.subr.bf16.mxu0 %v1822_v3 }
 0x15b   : > { %1825 = vmatpush3.bf16.msra.mxu0 %v1822_v3 }
 0x210   : > { %v739_v47 = vpop.f32.mrb[0].mxu1 }
 0x211   : > { %v1700_v48 = vpop.f32.mrb[1].mxu1  ;;  %v740_v50 = vadd.f32 %v1577_v46, %v739_v47  ;;  %v1684_v61 = vpop.f32.mrb[0].mxu0 }
 0x212   : > { %v742_v49 = vpop.f32.mrb[2].mxu1  ;;  %v632_v62 = vpop.f32.mrb[1].mxu0  ;;  %v641_v16 = vadd.f32 %v1684_v61, %v1568_v8 }
 0x213   : > { %v743_v51 = vadd.f32 %v1577_v46, %v742_v49  ;;  %v1701_v52 = vpop.f32.mrb[3].mxu1  ;;  %v1685_v63 = vpop.f32.mrb[2].mxu0  ;;  %v633_v10 = vadd.f32 %v1568_v8, %v632_v62 }
 0x214   : > { %v635_v0 = vpop.f32.mrb[3].mxu0  ;;  %v644_v15 = vadd.f32 %v1685_v63, %v1568_v8 }
 0x215   : > { %v1790_v53 = vpack.c.bf16 %v743_v51, %v740_v50  ;;  %v636_v9 = vadd.f32 %v1568_v8, %v635_v0 }
 0x217   : > { %1791 = vmatprep.subr.bf16.mxu1 %v1790_v53 }
 0x218   : > { %1793 = vmatpush3.bf16.msra.mxu1 %v1790_v53 }
 0x219   : > { %v1688_v4 = vpop.f32.mrb[4].mxu0 }
 0x21a   : > { %v648_v5 = vpop.f32.mrb[5].mxu0  ;;  %v657_v28 = vadd.f32 %v1688_v4, %v1568_v8 }
 0x21b   : > { %1707 = vmatmul.mubr.msk.f32.vlgmr.msra.gmra.mrb[4].mxu1 %vm754_vm2, %v747_v54  ;;  %v1689_v6 = vpop.f32.mrb[6].mxu0  ;;  %v649_v22 = vadd.f32 %v1568_v8, %v648_v5 }
 0x21c   : > { %1709 = vmatprep.mubr.msk.f32.mxu1 %vm754_vm2, %v748_v55  ;;  %v651_v7 = vpop.f32.mrb[7].mxu0  ;;  %v660_v27 = vadd.f32 %v1689_v6, %v1568_v8 }
 0x21d   : > { %v652_v20 = vadd.f32 %v1568_v8, %v651_v7 }
 0x21f   : > { %1710 = vmatmul.mubr.msk.f32.gmra.mrb[6].mxu1 %vm754_vm2, %v749_v56 }
 0x220   : > { %1712 = vmatprep.mubr.msk.f32.mxu1 %vm754_vm2, %v750_v57 }
 0x223   : > { %1713 = vmatmul.mubr.msk.f32.gmra.mrb[8].mxu1 %vm754_vm2, %v751_v58 }
 0x224   : > { %1715 = vmatprep.mubr.msk.f32.mxu1 %vm754_vm2, %v752_v59 }
 0x227   : > { %1716 = vmatmul.mubr.msk.f32.gmra.mrb[10].mxu1 %vm754_vm2, %v753_v60 }
 0x228   : > { %1778 = vmatprep.mubr.msk.f32.mxu1 %vm585_vm1, %v1117_v33 }
 0x2ee   : > { %v1708_v11 = vpop.f32.mrb[4].mxu1 }
 0x2ef   : > { %v885_v12 = vmul.f32 %v1708_v11, %v636_v9  ;;  %v845_v13 = vpop.f32.mrb[5].mxu1 }
 0x2f0   : > { %v884_v14 = vmul.f32 %v845_v13, %v633_v10 }
 0x2f1   : > { %893 = vst [vmem:[%s2861_s27 + $0x8] sm:$0xff] %v885_v12 }
 0x2f2   : > { %892 = vst [vmem:[%s2861_s27] sm:$0xff] %v884_v14  ;;  %v1711_v17 = vpop.f32.mrb[6].mxu1  ;;  %1750 = vmatprep.mubr.f32.mxu0 %v884_v14 }
 0x2f3   : > { %v887_v18 = vmul.f32 %v1711_v17, %v644_v15  ;;  %v855_v19 = vpop.f32.mrb[7].mxu1  ;;  %1751 = vmatmul.mubr.f32.vlgmr.msra.gmra.mrb[8].mxu0 %v885_v12 }
 0x2f4   : > { %v886_v21 = vmul.f32 %v855_v19, %v641_v16 }
 0x2f5   : > { %895 = vst [vmem:[%s2861_s27 + $0x18] sm:$0xff] %v887_v18 }
 0x2f6   : > { %894 = vst [vmem:[%s2861_s27 + $0x10] sm:$0xff] %v886_v21  ;;  %v1714_v23 = vpop.f32.mrb[8].mxu1  ;;  %1753 = vmatprep.mubr.f32.mxu0 %v886_v21 }
 0x2f7   : > { %v889_v24 = vmul.f32 %v1714_v23, %v652_v20  ;;  %v865_v25 = vpop.f32.mrb[9].mxu1  ;;  %1754 = vmatmul.mubr.f32.gmra.mrb[10].mxu0 %v887_v18 }
 0x2f8   : > { %v888_v26 = vmul.f32 %v865_v25, %v649_v22 }
 0x2f9   : > { %897 = vst [vmem:[%s2861_s27 + $0x28] sm:$0xff] %v889_v24 }
 0x2fa   : > { %896 = vst [vmem:[%s2861_s27 + $0x20] sm:$0xff] %v888_v26  ;;  %v1717_v29 = vpop.f32.mrb[10].mxu1  ;;  %1756 = vmatprep.mubr.f32.mxu0 %v888_v26 }
 0x2fb   : > { %v891_v30 = vmul.f32 %v1717_v29, %v660_v27  ;;  %v875_v31 = vpop.f32.mrb[11].mxu1  ;;  %1757 = vmatmul.mubr.f32.gmra.mrb[12].mxu0 %v889_v24 }
 0x2fc   : > { %v890_v32 = vmul.f32 %v875_v31, %v657_v28 }
 0x2fd   : > { %899 = vst [vmem:[%s2861_s27 + $0x38] sm:$0xff] %v891_v30 }
 0x2fe   : > { %898 = vst [vmem:[%s2861_s27 + $0x30] sm:$0xff] %v890_v32  ;;  %1759 = vmatprep.mubr.f32.mxu0 %v890_v32 }
 0x2ff   : > { %1760 = vmatmul.mubr.f32.gmra.mrb[14].mxu0 %v891_v30 }
 0x3c6   : > { %v1752_v34 = vpop.f32.mrb[8].mxu0 }
 0x3c7   : > { %v1038_v35 = vand.u32 2147483647, %v1752_v34  ;;  %v982_v36 = vpop.f32.mrb[9].mxu0  ;;  %vm1022_vm3 = vcmp.ge.f32.partialorder %v1752_v34, 0.0 }
 0x3c8   : > { %v1037_v37 = vand.u32 2147483647, %v982_v36  ;;  %vm1021_vm4 = vcmp.ge.f32.partialorder %v982_v36, 0.0  ;;  %v1030_v44 = vsel %vm1022_vm3, 1.0, %v2409_v43 }
 0x3c9   : > { %1986 = vrsqrt.f32 %v1038_v35  ;;  %vm1054_vm5 = vcmp.eq.f32.partialorder %v1038_v35, inf  ;;  %vm1056_vm6 = vcmp.eq.f32.partialorder %v1038_v35, 0.0  ;;  %v1057_v48 = vand.u32 2147483648, %v1038_v35 }
 0x3ca   : > { %1988 = vrsqrt.f32 %v1037_v37  ;;  %v1755_v38 = vpop.f32.mrb[10].mxu0  ;;  %v1029_v49 = vsel %vm1021_vm4, 1.0, %v2409_v43  ;;  %vm1047_vm8 = vcmp.eq.f32.partialorder %v1037_v37, inf  ;;  %vm1049_vm9 = vcmp.eq.f32.partialorder %v1037_v37, 0.0 }
 0x3cb   : > { %v2872_v39 = vand.u32 2147483647, %v1755_v38  ;;  %v992_v40 = vpop.f32.mrb[11].mxu0  ;;  %vm1024_vm7 = vcmp.ge.f32.partialorder %v1755_v38, 0.0  ;;  %v1050_v50 = vand.u32 2147483648, %v1037_v37 }
 0x3cc   : > { %v2874_v41 = vand.u32 2147483647, %v992_v40  ;;  %vm1023_vm10 = vcmp.ge.f32.partialorder %v992_v40, 0.0  ;;  %v1032_v53 = vsel %vm1024_vm7, 1.0, %v2409_v43 }
 0x3cd   : > { %1990 = vrsqrt.f32 %v2872_v39  ;;  %vm1068_vm11 = vcmp.eq.f32.partialorder %v2872_v39, inf  ;;  %vm1070_vm12 = vcmp.eq.f32.partialorder %v2872_v39, 0.0  ;;  %v1071_v58 = vand.u32 2147483648, %v2872_v39 }
 0x3ce   : > { %1992 = vrsqrt.f32 %v2874_v41  ;;  %v1758_v42 = vpop.f32.mrb[12].mxu0  ;;  %v1031_v61 = vsel %vm1023_vm10, 1.0, %v2409_v43  ;;  %vm1061_vm14 = vcmp.eq.f32.partialorder %v2874_v41, inf  ;;  %vm1063_vm15 = vcmp.eq.f32.partialorder %v2874_v41, 0.0 }
 0x3cf   : > { %v2879_v45 = vand.u32 2147483647, %v1758_v42  ;;  %v1002_v46 = vpop.f32.mrb[13].mxu0  ;;  %vm1026_vm13 = vcmp.ge.f32.partialorder %v1758_v42, 0.0  ;;  %v1064_v63 = vand.u32 2147483648, %v2874_v41 }
 0x3d0   : > { %v2881_v47 = vand.u32 2147483647, %v1002_v46  ;;  %v1034_v3 = vsel %vm1026_vm13, 1.0, %v2409_v43  ;;  %vm1025_vm0 = vcmp.ge.f32.partialorder %v1002_v46, 0.0 }
 0x3d1   : > { %1994 = vrsqrt.f32 %v2879_v45  ;;  %vm1082_vm2 = vcmp.eq.f32.partialorder %v2879_v45, inf  ;;  %vm1084_vm3 = vcmp.eq.f32.partialorder %v2879_v45, 0.0  ;;  %v1085_v10 = vand.u32 2147483648, %v2879_v45 }
 0x3d2   : > { %1996 = vrsqrt.f32 %v2881_v47  ;;  %v1761_v51 = vpop.f32.mrb[14].mxu0  ;;  %v1033_v13 = vsel %vm1025_vm0, 1.0, %v2409_v43  ;;  %vm1075_vm4 = vcmp.eq.f32.partialorder %v2881_v47, inf  ;;  %v1078_v24 = vand.u32 2147483648, %v2881_v47 }
 0x3d3   : > { %v1987_v52 = vpop.eup %1986  ;;  %v2889_v54 = vand.u32 2147483647, %v1761_v51  ;;  %v2891_v55 = vpop.f32.mrb[15].mxu0 }
 0x3d4   : > { %v1989_v56 = vpop.eup %1988  ;;  %v1053_v57 = vmul.f32 %v1987_v52, %v1038_v35  ;;  %v2895_v59 = vand.u32 2147483647, %v2891_v55  ;;  %vm1027_vm7 = vcmp.ge.f32.partialorder %v2891_v55, 0.0  ;;  %v1121_v55 = vld [vmem:[#allocation14 + $0x20] sm:$0xff] }
 0x3d5   : > { %v1046_v60 = vmul.f32 %v1989_v56, %v1037_v37  ;;  %1998 = vrsqrt.f32 %v2889_v54  ;;  %v1099_v38 = vand.u32 2147483648, %v2889_v54 }
 0x3d6   : > { %v1055_v62 = vsel %vm1054_vm5, %v1038_v35, %v1053_v57  ;;  %2000 = vrsqrt.f32 %v2895_v59  ;;  %vm1028_vm5 = vcmp.ge.f32.partialorder %v1761_v51, 0.0  ;;  %vm1089_vm10 = vcmp.eq.f32.partialorder %v2895_v59, inf  ;;  %v1118_v57 = vld [vmem:[#allocation14 + $0x8] sm:$0xff] }
 0x3d7   : > { %v1991_v0 = vpop.eup %1990  ;;  %v1058_v1 = vsel %vm1056_vm6, %v1057_v48, %v1055_v62  ;;  %v1048_v2 = vsel %vm1047_vm8, %v1037_v37, %v1046_v60  ;;  %vm1077_vm6 = vcmp.eq.f32.partialorder %v2881_v47, 0.0  ;;  %v1036_v28 = vsel %vm1028_vm5, 1.0, %v2409_v43  ;;  %v1123_v60 = vld [vmem:[#allocation14 + $0x30] sm:$0xff] }
 0x3d8   : > { %v1993_v4 = vpop.eup %1992  ;;  %v2907_v5 = vmul.f32 %v1058_v1, %v1030_v44  ;;  %v1051_v6 = vsel %vm1049_vm9, %v1050_v50, %v1048_v2  ;;  %v1067_v7 = vmul.f32 %v1991_v0, %v2872_v39  ;;  %vm1096_vm8 = vcmp.eq.f32.partialorder %v2889_v54, inf }
 0x3d9   : > { %v2912_v8 = vmul.f32 %v1051_v6, %v1029_v49  ;;  %v1060_v9 = vmul.f32 %v1993_v4, %v2874_v41  ;;  %vm1098_vm9 = vcmp.eq.f32.partialorder %v2889_v54, 0.0  ;;  %v1092_v44 = vand.u32 2147483648, %v2895_v59 }
 0x3da   : > { %v1110_v11 = vmul.f32 %v2907_v5, %v2907_v5  ;;  %v1069_v12 = vsel %vm1068_vm11, %v2872_v39, %v1067_v7  ;;  %vm1091_vm11 = vcmp.eq.f32.partialorder %v2895_v59, 0.0  ;;  %v1035_v49 = vsel %vm1027_vm7, 1.0, %v2409_v43  ;;  %v1120_v43 = vld [vmem:[#allocation14 + $0x18] sm:$0xff] }
 0x3db   : > { %v1995_v14 = vpop.eup %1994  ;;  %v1109_v15 = vmul.f32 %v2912_v8, %v2912_v8  ;;  %v1072_v16 = vsel %vm1070_vm12, %v1071_v58, %v1069_v12  ;;  %v1062_v17 = vsel %vm1061_vm14, %v2874_v41, %v1060_v9  ;;  %v1119_v58 = vld [vmem:[#allocation14 + $0x10] sm:$0xff]  ;;  %vm1254_vm12 = vcmask 261120  }
 0x3dc   : > { %v1997_v18 = vpop.eup %1996  ;;  %v2931_v19 = vmul.f32 %v1072_v16, %v1032_v53  ;;  %v1065_v20 = vsel %vm1063_vm15, %v1064_v63, %v1062_v17  ;;  %v1081_v21 = vmul.f32 %v1995_v14, %v2879_v45 }
 0x3dd   : > { %v2937_v22 = vmul.f32 %v1065_v20, %v1031_v61  ;;  %v1074_v23 = vmul.f32 %v1997_v18, %v2881_v47  ;;  %v1826_v25 = vpack.c.bf16 %v1110_v11, %v1109_v15  ;;  %v1124_v61 = vld [vmem:[#allocation14 + $0x38] sm:$0xff] }
 0x3de   : > { %v1112_v26 = vmul.f32 %v2931_v19, %v2931_v19  ;;  %v1083_v27 = vsel %vm1082_vm2, %v2879_v45, %v1081_v21 }
 0x3df   : > { %v1999_v29 = vpop.eup %1998  ;;  %v1111_v30 = vmul.f32 %v2937_v22, %v2937_v22  ;;  %v1086_v31 = vsel %vm1084_vm3, %v1085_v10, %v1083_v27  ;;  %v1076_v32 = vsel %vm1075_vm4, %v2881_v47, %v1074_v23  ;;  %1827 = vmatprep.subr.bf16.mxu1 %v1826_v25 }
 0x3e0   : > { %v2001_v33 = vpop.eup %2000  ;;  %v2956_v34 = vmul.f32 %v1086_v31, %v1034_v3  ;;  %v1079_v35 = vsel %vm1077_vm6, %v1078_v24, %v1076_v32  ;;  %v1095_v36 = vmul.f32 %v1999_v29, %v2889_v54  ;;  %1829 = vmatpush3.bf16.msra.mxu1 %v1826_v25 }
 0x3e1   : > { %v2962_v37 = vmul.f32 %v1079_v35, %v1033_v13  ;;  %v1088_v39 = vmul.f32 %v2001_v33, %v2895_v59  ;;  %v1830_v40 = vpack.c.bf16 %v1112_v26, %v1111_v30 }
 0x3e2   : > { %v1114_v41 = vmul.f32 %v2956_v34, %v2956_v34  ;;  %v1097_v42 = vsel %vm1096_vm8, %v2889_v54, %v1095_v36 }
 0x3e3   : > { %v1113_v45 = vmul.f32 %v2962_v37, %v2962_v37  ;;  %v1100_v46 = vsel %vm1098_vm9, %v1099_v38, %v1097_v42  ;;  %v1090_v47 = vsel %vm1089_vm10, %v2895_v59, %v1088_v39  ;;  %1831 = vmatprep.subr.bf16.mxu1 %v1830_v40  ;;  %v1122_v59 = vld [vmem:[#allocation14 + $0x28] sm:$0xff] }
 0x3e4   : > { %v2975_v48 = vmul.f32 %v1100_v46, %v1036_v28  ;;  %v1093_v50 = vsel %vm1091_vm11, %v1092_v44, %v1090_v47  ;;  %1833 = vmatpush3.bf16.msra.mxu1 %v1830_v40 }
 0x3e5   : > { %v2980_v51 = vmul.f32 %v1093_v50, %v1035_v49  ;;  %v1834_v52 = vpack.c.bf16 %v1114_v41, %v1113_v45 }
 0x3e6   : > { %v1116_v53 = vmul.f32 %v2975_v48, %v2975_v48 }
 0x3e7   : > { %v1115_v54 = vmul.f32 %v2980_v51, %v2980_v51  ;;  %1835 = vmatprep.subr.bf16.mxu1 %v1834_v52 }
 0x3e8   : > { %1837 = vmatpush3.bf16.msra.mxu1 %v1834_v52 }
 0x3e9   : > { %v1838_v56 = vpack.c.bf16 %v1116_v53, %v1115_v54 }
 0x3eb   : > { %1839 = vmatprep.subr.bf16.mxu1 %v1838_v56 }
 0x3ec   : > { %1841 = vmatpush3.bf16.msra.mxu1 %v1838_v56 }
 0x3ef   : > { %1779 = vmatmul.mubr.msk.f32.vlgmr.msra.gmra.mrb[12].mxu1 %vm585_vm1, %v1118_v57 }
 0x3f0   : > { %1781 = vmatprep.mubr.msk.f32.mxu1 %vm585_vm1, %v1119_v58 }
 0x3f3   : > { %1782 = vmatmul.mubr.msk.f32.gmra.mrb[14].mxu1 %vm585_vm1, %v1120_v43 }
 0x3f4   : > { %1784 = vmatprep.mubr.msk.f32.mxu1 %vm585_vm1, %v1121_v55 }
 0x3f7   : > { %1785 = vmatmul.mubr.msk.f32.gmra.mrb[16].mxu1 %vm585_vm1, %v1122_v59 }
 0x3f8   : > { %1787 = vmatprep.mubr.msk.f32.mxu1 %vm585_vm1, %v1123_v60 }
 0x3fb   : > { %1788 = vmatmul.mubr.msk.f32.gmra.mrb[18].mxu1 %vm585_vm1, %v1124_v61 }
 0x4c2   : > { %v1780_v62 = vpop.f32.mrb[12].mxu1 }
 0x4c3   : > { %v1258_v63 = vsel %vm1254_vm12, %v1780_v62, 0.0  ;;  %v1215_v0 = vpop.f32.mrb[13].mxu1 }
 0x4c4   : > { %1259 = vadd.xlane.f32.xlu0 %v1258_v63  ;;  %v1255_v2 = vsel %vm1254_vm12, %v1215_v0, 0.0 }
 0x4c6   : > { %v1783_v1 = vpop.f32.mrb[14].mxu1 }
 0x4c7   : > { %v1264_v3 = vsel %vm1254_vm12, %v1783_v1, 0.0  ;;  %v1225_v4 = vpop.f32.mrb[15].mxu1 }
 0x4c8   : > { %1256 = vadd.xlane.f32.xlu0 %v1255_v2  ;;  %1265 = vadd.xlane.f32.xlu1 %v1264_v3  ;;  %v1261_v9 = vsel %vm1254_vm12, %v1225_v4, 0.0 }
 0x4ca   : > { %v1786_v6 = vpop.f32.mrb[16].mxu1 }
 0x4cb   : > { %v1235_v7 = vpop.f32.mrb[17].mxu1  ;;  %v1270_v11 = vsel %vm1254_vm12, %v1786_v6, 0.0 }
 0x4cc   : > { %1262 = vadd.xlane.f32.xlu1 %v1261_v9  ;;  %v1267_v10 = vsel %vm1254_vm12, %v1235_v7, 0.0 }
 0x4cd   : > { %1268 = vadd.xlane.f32.xlu0 %v1267_v10 }
 0x4ce   : > { %v1789_v12 = vpop.f32.mrb[18].mxu1 }
 0x4cf   : > { %v1245_v13 = vpop.f32.mrb[19].mxu1  ;;  %v1276_v15 = vsel %vm1254_vm12, %v1789_v12, 0.0 }
 0x4d0   : > { %1271 = vadd.xlane.f32.xlu1 %v1270_v11  ;;  %v1273_v14 = vsel %vm1254_vm12, %v1245_v13, 0.0 }
 0x4d1   : > { %1274 = vadd.xlane.f32.xlu0 %v1273_v14 }
 0x4d4   : > { %1277 = vadd.xlane.f32.xlu1 %v1276_v15 }
 0x4d5   : > { %2287 = shalt.err (!%p2284_p3)
}
 0x4d6   : > { %s2288_s3 = scalar_lea.hbm %s3010_s24, 1024  ;;  %s2292_s12 = scalar_lea.hbm %s3166_s23, 2048 }
 0x4d7   : > { %p2289_p12 = scmp.ne.s32.totalorder %s3010_s24, %s2288_s3  ;;  %p2293_p0 = scmp.lt.u32.totalorder %s3010_s24, %s3166_s23 }
 0x4d8   : > { %p2294_p7 = scmp.lt.u32.totalorder %s2292_s12, %s2288_s3  ;;  %p2296_p6 = scmp.lt.u32.totalorder %s2288_s3, %s3010_s24 }
 0x4d9   : > { %p2290_p1 = pnand %p2289_p12, %p3167_p10 }
 0x4da   : > { %p2295_p2 = por %p2294_p7, %p2293_p0 }
 0x4db   : > { %p2291_p13 = pneg %p2290_p1 }
 0x4dc   : > { %p2297_p5 = por %p2296_p6, %p2295_p2 }
 0x4de   : > { %p2298_p9 = pnand %p2297_p5, %p2291_p13 }
 0x4e0   : > { %2301 = shalt.err (!%p2298_p9)
}
 0x4e1   : > { %s2411_s21 = smov 128   ;;  %s2412_s18 = smov 8  }
 0x4e2   : > { %1875 = dma.vmem_to_hbm [thread:$0]  (%p3167_p10), %s3003_s9, 1024, %s3010_s24, %s1317_s0, %s2411_s21, %s2411_s21, %s2412_s18  }
 0x4e3   : > { %s518_s9 = scalar_lea.vmem [#allocation17], %s2803_s25  ;;  %s3168_s4 = sld [smem:[#allocation34_spill]] }
 0x4e4   : > { %s1330_s25 = sshll.u32 %s518_s9, 4  ;;  %s1312_s26 = scalar_lea.sflag [#allocation4], %s2800_s6  ;;  %s3062_s25 = int_to_ptr.vmem [resolvable:$true] %s1330_s25 }
 0x4e5   : > { %s2302_s2 = scalar_lea.vmem %s3062_s25, 1024  ;;  %s2413_s3 = smov [#allocation17]  }
 0x4e6   : > { %p2303_p4 = scmp.ne.s32.totalorder %s3062_s25, %s2302_s2  ;;  %s2306_s19 = sshll.u32 %s2413_s3, 4  ;;  %s2307_s19 = int_to_ptr.vmem [resolvable:$false] %s2306_s19 }
 0x4e7   : > { %s2308_s5 = scalar_lea.vmem %s2307_s19, 2048  ;;  %p2309_p3 = scmp.lt.s32.totalorder %s3062_s25, %s2307_s19 }
 0x4e8   : > { %p2304_p8 = pnand %p2303_p4, %p3167_p10  ;;  %p2310_p12 = scmp.lt.s32.totalorder %s2308_s5, %s2302_s2 }
 0x4e9   : > { %s3060_s28 = scalar_lea.hbm %s3168_s4, %s1609_s30 }
 0x4ea   : > { %p2305_p11 = pneg %p2304_p8  ;;  %p2311_p1 = por %p2310_p12, %p2309_p3 }
 0x4ec   : > { %p2312_p13 = pnand %p2311_p1, %p2305_p11 }
 0x551   : > { %v1260_v16 = vpop.xlane.xlu0 %1259 }
 0x552   : > { %v1280_v17 = vmax.f32 %v1260_v16, 1e-24 }
 0x554   : > { %2002 = vrsqrt.f32 %v1280_v17 }
 0x555   : > { %v1257_v18 = vpop.xlane.xlu0 %1256  ;;  %v1266_v20 = vpop.xlane.xlu1 %1265 }
 0x556   : > { %v1279_v21 = vmax.f32 %v1257_v18, 1e-24  ;;  %v1282_v23 = vmax.f32 %v1266_v20, 1e-24 }
 0x558   : > { %2004 = vrsqrt.f32 %v1279_v21 }
 0x559   : > { %2006 = vrsqrt.f32 %v1282_v23  ;;  %v1263_v24 = vpop.xlane.xlu1 %1262 }
 0x55a   : > { %v1281_v25 = vmax.f32 %v1263_v24, 1e-24  ;;  %v1269_v26 = vpop.xlane.xlu0 %1268 }
 0x55b   : > { %v1283_v27 = vmax.f32 %v1269_v26, 1e-24 }
 0x55c   : > { %2008 = vrsqrt.f32 %v1281_v25 }
 0x55d   : > { %2010 = vrsqrt.f32 %v1283_v27  ;;  %v1272_v28 = vpop.xlane.xlu1 %1271 }
 0x55e   : > { %v2003_v29 = vpop.eup %2002  ;;  %v1284_v30 = vmax.f32 %v1272_v28, 1e-24  ;;  %v1275_v31 = vpop.xlane.xlu0 %1274 }
 0x55f   : > { %v1296_v32 = vmul.f32 %v2003_v29, %v2907_v5  ;;  %v1285_v33 = vmax.f32 %v1275_v31, 1e-24 }
 0x560   : > { %2012 = vrsqrt.f32 %v1284_v30 }
 0x561   : > { %1304 = vst.msk [vmem:[%s518_s9 + $0x8] sm:$0xff] %vm1254_vm12, %v1296_v32  ;;  %2014 = vrsqrt.f32 %v1285_v33  ;;  %v1278_v35 = vpop.xlane.xlu1 %1277 }
 0x562   : > { %v2005_v36 = vpop.eup %2004  ;;  %v1286_v38 = vmax.f32 %v1278_v35, 1e-24 }
 0x563   : > { %v2007_v39 = vpop.eup %2006  ;;  %v1295_v40 = vmul.f32 %v2005_v36, %v2912_v8 }
 0x564   : > { %v1298_v41 = vmul.f32 %v2007_v39, %v2931_v19  ;;  %2016 = vrsqrt.f32 %v1286_v38 }
 0x565   : > { %1303 = vst.msk [vmem:[%s518_s9] sm:$0xff] %vm1254_vm12, %v1295_v40 }
 0x566   : > { %v2009_v42 = vpop.eup %2008  ;;  %1306 = vst.msk [vmem:[%s518_s9 + $0x18] sm:$0xff] %vm1254_vm12, %v1298_v41 }
 0x567   : > { %v2011_v5 = vpop.eup %2010  ;;  %v1297_v44 = vmul.f32 %v2009_v42, %v2937_v22 }
 0x568   : > { %v1299_v45 = vmul.f32 %v2011_v5, %v2962_v37 }
 0x569   : > { %1305 = vst.msk [vmem:[%s518_s9 + $0x10] sm:$0xff] %vm1254_vm12, %v1297_v44 }
 0x56a   : > { %v2013_v46 = vpop.eup %2012  ;;  %1307 = vst.msk [vmem:[%s518_s9 + $0x20] sm:$0xff] %vm1254_vm12, %v1299_v45 }
 0x56b   : > { %v2015_v8 = vpop.eup %2014  ;;  %v1300_v19 = vmul.f32 %v2013_v46, %v2956_v34 }
 0x56c   : > { %v1301_v47 = vmul.f32 %v2015_v8, %v2980_v51 }
 0x56d   : > { %1308 = vst.msk [vmem:[%s518_s9 + $0x28] sm:$0xff] %vm1254_vm12, %v1300_v19 }
 0x56e   : > { %v2017_v49 = vpop.eup %2016  ;;  %1309 = vst.msk [vmem:[%s518_s9 + $0x30] sm:$0xff] %vm1254_vm12, %v1301_v47 }
 0x56f   : > { %v1302_v22 = vmul.f32 %v2017_v49, %v2975_v48 }
 0x571   : > { %1310 = vst.msk [vmem:[%s518_s9 + $0x38] sm:$0xff] %vm1254_vm12, %v1302_v22 }
 0x572   : > { %2315 = shalt.err (!%p2312_p13)
}
 0x573   : > { %s2316_s30 = scalar_lea.hbm %s3060_s28, 1024  ;;  %s2320_s10 = scalar_lea.hbm %s3168_s4, 2048 }
 0x574   : > { %p2317_p0 = scmp.ne.s32.totalorder %s3060_s28, %s2316_s30  ;;  %p2321_p6 = scmp.lt.u32.totalorder %s3060_s28, %s3168_s4 }
 0x575   : > { %p2322_p5 = scmp.lt.u32.totalorder %s2320_s10, %s2316_s30  ;;  %p2324_p4 = scmp.lt.u32.totalorder %s2316_s30, %s3060_s28 }
 0x576   : > { %p2318_p7 = pnand %p2317_p0, %p3167_p10 }
 0x577   : > { %p2323_p9 = por %p2322_p5, %p2321_p6 }
 0x578   : > { %p2319_p2 = pneg %p2318_p7 }
 0x579   : > { %p2325_p8 = por %p2324_p4, %p2323_p9 }
 0x57b   : > { %p2326_p11 = pnand %p2325_p8, %p2319_p2 }
 0x57d   : > { %2329 = shalt.err (!%p2326_p11)
}
 0x57e   : > { %1874 = dma.vmem_to_hbm [thread:$0]  (%p3167_p10), %s3062_s25, 1024, %s3060_s28, %s1312_s26, %s2411_s21, %s2411_s21, %s2412_s18  }
 0x57f PF: > { %s1361_s24 = sand.u32 1, %s2380_s13   ;;  %p3169_p3 = scmp.ne.s32.totalorder %s3153_s22, 0 }
 0x580   : > { %p3170_p12 = scmp.ge.s32.totalorder %s2392_s16, 2  ;;  %s1362_s0 = scalar_lea.sflag [#allocation4], %s1361_s24 }
 0x582   : > { %p1908_p1 = pnand %p3170_p12, %p3169_p3 }
 0x584   : > { %2371 = dma.done.wait (!%p1908_p1), %s1362_s0, 1024  }
 0x585   : > { %2373 = vsyncadd (!%p1908_p1), %s1362_s0, 4294966272  ;;  %s1371_s17 = scalar_lea.sflag [#allocation19], %s1361_s24 }
 0x586   : > { %2375 = dma.done.wait (!%p1908_p1), %s1371_s17, 1024  }
 0x587   : > { %2377 = vsyncadd (!%p1908_p1), %s1371_s17, 4294966272  ;;  %p33_p10 = scmp.ge.s32.totalorder %s2680_s11, 4   ;;  %s3171_s13 = smov %s2384_s14 }
 0x588   : > { %s3172_s14 = smov %s2388_s15  ;;  %s3173_s15 = smov %s2692_s29 }
 0x589   : > { %s3174_s16 = smov %s2680_s11  ;;  %35 = sbr.rel (!%p33_p10) target bundleno = 21 (0x15), region = 159 }
 0x590   :  { %1376 = vsyncpa [#allocation3], 1 }
 0x591   :  { %1378 = vsyncpa [#allocation3 + $0x1], 1 }
 0x592   :  { %1379 = vsyncpa [#allocation6], 1 }
 0x593   :  { %1381 = vsyncpa [#allocation6 + $0x1], 1 }
 0x594   :  { %1382 = vsyncpa [#allocation9], 1 }
 0x595   :  { %1383 = vsyncpa [#allocation12], 1 }
 0x596   :  { %1384 = vsyncpa [#allocation15], 1 }
 0x597   :  { %1385 = vsyncpa [#allocation4], 1 }
 0x598   :  { %1387 = vsyncpa [#allocation4 + $0x1], 1 }
 0x599   :  { %1388 = vsyncpa [#allocation19], 1 }
 0x59a   :  { %1390 = vsyncpa [#allocation19 + $0x1], 1 }

</bundles_post_ra>
